<compile_context>
chip_gen: v6e
topology: v6e:2x2x1
jax: 0.10.0
libtpu: 0.0.40
codegen_flags: <defaults>
</compile_context>

<pallas_src>
import functools

import jax
import jax.numpy as jnp
from jax.experimental import pallas as pl
from jax.experimental.pallas import tpu as pltpu

_LANE = 128
_SUBLANE = 8


def quantile_loss_kernel(q_ref, preds_ref, target_ref, out_ref, acc_ref, *,
                         inv_n):
    """One grid step: pinball loss over a (block_rows, 128) tile, accumulated."""
    i = pl.program_id(0)

    @pl.when(i == 0)
    def _init():
        acc_ref[...] = jnp.zeros_like(acc_ref)

    q = q_ref[0]                                            # scalar from SMEM
    preds = preds_ref[...].astype(jnp.float32)
    target = target_ref[...].astype(jnp.float32)
    error = target - preds                                  # (block_rows, 128)
    loss = jnp.maximum(q * error, (q - 1.0) * error)
    # Pure-VPU partial reduction: collapse groups of 8 rows (one vreg each)
    # into the resident (8, 128) accumulator; no per-step cross-lane work.
    acc_ref[...] += jnp.sum(loss.reshape(-1, _SUBLANE, _LANE), axis=0)

    @pl.when(i == pl.num_programs(0) - 1)
    def _finalize():
        # Single cross-lane/sublane reduce, then mean over the TRUE count.
        out_ref[...] = jnp.sum(acc_ref[...], keepdims=True) * inv_n


def _round_up(x, m):
    return ((x + m - 1) // m) * m


def quantile_loss(preds, target, quantile, *, max_block_rows=2048):
    """Mean pinball loss of preds vs. target (any matching shapes) -> scalar."""
    dtype = jnp.result_type(preds.dtype, target.dtype)
    preds_f = preds.reshape(-1).astype(dtype)
    target_f = target.reshape(-1).astype(dtype)
    n = preds_f.shape[0]

    # Sublane multiple for the input dtype (8 for 4-byte, 16 for 2-byte, ...).
    sub = _SUBLANE * max(1, 4 // jnp.dtype(dtype).itemsize)

    # Lane-dense layout: pad to a whole number of (block_rows, 128) tiles.
    rows = max(1, pl.cdiv(n, _LANE))
    block_rows = min(_round_up(max_block_rows, sub), _round_up(rows, sub))
    rows_padded = _round_up(rows, block_rows)
    pad = rows_padded * _LANE - n

    # Zero padding (preds == target == 0) contributes exactly 0 to the sum.
    preds_2d = jnp.pad(preds_f, (0, pad)).reshape(rows_padded, _LANE)
    target_2d = jnp.pad(target_f, (0, pad)).reshape(rows_padded, _LANE)
    num_blocks = rows_padded // block_rows

    q_arr = jnp.reshape(jnp.asarray(quantile, jnp.float32), (1,))
    kernel = functools.partial(quantile_loss_kernel, inv_n=1.0 / float(n))

    out = pl.pallas_call(
        kernel,
        out_shape=jax.ShapeDtypeStruct((1, 1), jnp.float32),
        grid=(num_blocks,),
        in_specs=[
            pl.BlockSpec(memory_space=pltpu.MemorySpace.SMEM),        # quantile
            pl.BlockSpec((block_rows, _LANE), lambda i: (i, 0)),      # preds
            pl.BlockSpec((block_rows, _LANE), lambda i: (i, 0)),      # target
        ],
        out_specs=pl.BlockSpec((1, 1), lambda i: (0, 0)),             # resident
        scratch_shapes=[pltpu.VMEM((_SUBLANE, _LANE), jnp.float32)],  # partials
        compiler_params=pltpu.CompilerParams(
            dimension_semantics=("arbitrary",)),
    )(q_arr, preds_2d, target_2d)
    return out[0, 0]


def _ref_loss(preds, target, quantile):
    err = target.astype(jnp.float32) - preds.astype(jnp.float32)
    return jnp.mean(jnp.maximum(quantile * err, (quantile - 1.0) * err))


if __name__ == "__main__":
    key = jax.random.PRNGKey(0)
    kp, kt, kp2, kt2 = jax.random.split(key, 4)

    # 1) Small shapes consistent with the module: per-sample predictions (B, 1).
    B = 2
    quantile = 0.9
    preds = jax.random.normal(kp, (B, 1), jnp.float32)
    target = jax.random.normal(kt, (B, 1), jnp.float32)

    loss = jax.jit(quantile_loss, static_argnames=("max_block_rows",))(
        preds, target, quantile)
    loss = jax.block_until_ready(loss)
    ref = _ref_loss(preds, target, quantile)
    assert loss.shape == ()
    assert bool(jnp.isfinite(loss))
    assert bool(jnp.allclose(loss, ref, rtol=1e-6, atol=1e-6)), (loss, ref)

    # 2) Non-multiple-of-128 size with multiple grid steps (exercises padding
    #    and the cross-step accumulator path).
    preds2 = jax.random.normal(kp2, (16, 80), jnp.float32)
    target2 = jax.random.normal(kt2, (16, 80), jnp.float32)
    loss2 = jax.jit(quantile_loss, static_argnames=("max_block_rows",))(
        preds2, target2, 0.25, max_block_rows=8)
    loss2 = jax.block_until_ready(loss2)
    ref2 = _ref_loss(preds2, target2, 0.25)
    assert bool(jnp.allclose(loss2, ref2, rtol=1e-6, atol=1e-6)), (loss2, ref2)

    print("KERNEL_OK")
</pallas_src>

<mosaic_0001>
module attributes {stable_mosaic.version = 11 : i64} {
  func.func @quantile_loss_kernel(%arg0: i32, %arg1: memref<1xf32, #tpu.memory_space<smem>>, %arg2: memref<8x128xf32, #tpu.memory_space<vmem>>, %arg3: memref<8x128xf32, #tpu.memory_space<vmem>>, %arg4: memref<1x1xf32, #tpu.memory_space<vmem>>, %arg5: memref<8x128xf32, #tpu.memory_space<vmem>>) attributes {dimension_semantics = [#tpu.dimension_semantics<arbitrary>], iteration_bounds = array<i64: 1>, scalar_prefetch = 0 : i64, scratch_operands = 1 : i64, tpu.core_type = #tpu.core_type<tc>, window_params = [{transform_indices = @transform_0, window_bounds = array<i64: 1>}, {transform_indices = @transform_1, window_bounds = array<i64: 8, 128>}, {transform_indices = @transform_2, window_bounds = array<i64: 8, 128>}, {pipeline_mode = #tpu.pipeline_mode<synchronous>, transform_indices = @transform_3, window_bounds = array<i64: 1, 1>}]} {
    %c0_i32 = arith.constant 0 : i32
    %0 = arith.cmpi eq, %arg0, %c0_i32 : i32
    %1 = arith.extui %0 : i1 to i32
    %c0_i32_0 = arith.constant 0 : i32
    %2 = arith.cmpi ne, %1, %c0_i32_0 : i32
    scf.if %2 {
      %cst_12 = arith.constant 0.000000e+00 : f32
      %21 = vector.broadcast %cst_12 : f32 to vector<8x128xf32>
      %c0_13 = arith.constant 0 : index
      %c0_14 = arith.constant 0 : index
      %22 = vector.load %arg5[%c0_13, %c0_14] : memref<8x128xf32, #tpu.memory_space<vmem>>, vector<8x128xf32>
      tpu.vector_store %arg5[%c0_13, %c0_14], %21 {strides = array<i32>} : memref<8x128xf32, #tpu.memory_space<vmem>>, vector<8x128xf32>,
    } else {
    }
    %c0 = arith.constant 0 : index
    %3 = memref.load %arg1[%c0] : memref<1xf32, #tpu.memory_space<smem>>
    %c0_1 = arith.constant 0 : index
    %c0_2 = arith.constant 0 : index
    %4 = vector.load %arg2[%c0_1, %c0_2] : memref<8x128xf32, #tpu.memory_space<vmem>>, vector<8x128xf32>
    %c0_3 = arith.constant 0 : index
    %c0_4 = arith.constant 0 : index
    %5 = vector.load %arg3[%c0_3, %c0_4] : memref<8x128xf32, #tpu.memory_space<vmem>>, vector<8x128xf32>
    %6 = arith.subf %5, %4 : vector<8x128xf32>
    %7 = vector.broadcast %3 : f32 to vector<8x128xf32>
    %8 = arith.mulf %7, %6 : vector<8x128xf32>
    %cst = arith.constant 1.000000e+00 : f32
    %9 = arith.subf %3, %cst : f32
    %10 = vector.broadcast %9 : f32 to vector<8x128xf32>
    %11 = arith.mulf %10, %6 : vector<8x128xf32>
    %12 = arith.maximumf %8, %11 : vector<8x128xf32>
    %c0_5 = arith.constant 0 : index
    %c0_6 = arith.constant 0 : index
    %13 = vector.load %arg5[%c0_5, %c0_6] : memref<8x128xf32, #tpu.memory_space<vmem>>, vector<8x128xf32>
    %14 = vector.shape_cast %12 : vector<8x128xf32> to vector<1x8x128xf32>
    %cst_7 = arith.constant dense<0.000000e+00> : vector<8x128xf32>
    %15 = vector.multi_reduction <add>, %14, %cst_7 [0] : vector<1x8x128xf32> to vector<8x128xf32>
    %16 = arith.addf %13, %15 : vector<8x128xf32>
    %c0_8 = arith.constant 0 : index
    %c0_9 = arith.constant 0 : index
    %17 = vector.load %arg5[%c0_8, %c0_9] : memref<8x128xf32, #tpu.memory_space<vmem>>, vector<8x128xf32>
    tpu.vector_store %arg5[%c0_8, %c0_9], %16 {strides = array<i32>} : memref<8x128xf32, #tpu.memory_space<vmem>>, vector<8x128xf32>,
    %c0_i32_10 = arith.constant 0 : i32
    %18 = arith.cmpi eq, %arg0, %c0_i32_10 : i32
    %19 = arith.extui %18 : i1 to i32
    %c0_i32_11 = arith.constant 0 : i32
    %20 = arith.cmpi ne, %19, %c0_i32_11 : i32
    scf.if %20 {
      %c0_12 = arith.constant 0 : index
      %c0_13 = arith.constant 0 : index
      %21 = vector.load %arg5[%c0_12, %c0_13] : memref<8x128xf32, #tpu.memory_space<vmem>>, vector<8x128xf32>
      %22 = vector.shape_cast %21 : vector<8x128xf32> to vector<1x8x128xf32>
      %cst_14 = arith.constant dense<0.000000e+00> : vector<1xf32>
      %23 = vector.multi_reduction <add>, %22, %cst_14 [1, 2] : vector<1x8x128xf32> to vector<1xf32>
      %24 = vector.shape_cast %23 : vector<1xf32> to vector<1x1x1xf32>
      %25 = vector.extract %24[0, 0, 0] : f32 from vector<1x1x1xf32>
      %26 = vector.broadcast %25 : f32 to vector<1x1xf32>
      %cst_15 = arith.constant 5.000000e-01 : f32
      %27 = vector.broadcast %cst_15 : f32 to vector<1x1xf32>
      %28 = arith.mulf %26, %27 : vector<1x1xf32>
      %c0_16 = arith.constant 0 : index
      %c0_17 = arith.constant 0 : index
      %29 = vector.load %arg4[%c0_16, %c0_17] : memref<1x1xf32, #tpu.memory_space<vmem>>, vector<1x1xf32>
      tpu.vector_store %arg4[%c0_16, %c0_17], %28 {strides = array<i32>} : memref<1x1xf32, #tpu.memory_space<vmem>>, vector<1x1xf32>,
    } else {
    }
    return
  }
  func.func @transform_0(%arg0: i32) -> i32 {
    %c0_i32 = arith.constant 0 : i32
    %c0_i32_0 = arith.constant 0 : i32
    return %c0_i32 : i32
  }
  func.func @transform_1(%arg0: i32) -> (i32, i32) {
    %c0_i32 = arith.constant 0 : i32
    %c0_i32_0 = arith.constant 0 : i32
    return %arg0, %c0_i32 : i32, i32
  }
  func.func @transform_2(%arg0: i32) -> (i32, i32) {
    %c0_i32 = arith.constant 0 : i32
    %c0_i32_0 = arith.constant 0 : i32
    return %arg0, %c0_i32 : i32, i32
  }
  func.func @transform_3(%arg0: i32) -> (i32, i32) {
    %c0_i32 = arith.constant 0 : i32
    %c0_i32_0 = arith.constant 0 : i32
    %c0_i32_1 = arith.constant 0 : i32
    return %c0_i32, %c0_i32_0 : i32, i32
  }
}

</mosaic_0001>

<bundles_post_ra>
// kernel: quantile_loss.1
= control target key start
LH: loop header
LB: loop body
LE: loop exit
PB: predicated region body
PF: predicated region fallthrough
CT: control target
= control target key end

     0   :  { %s128_s0 = inlined_call_operand.<no memory space> [shape: f32[1], index: 0, kind: input, shape index: {}]   ;;  %s129_s1 = inlined_call_operand.vmem [shape: f32[8,128], index: 1, kind: input, shape index: {}]   ;;  %s130_s2 = inlined_call_operand.vmem [shape: f32[8,128], index: 2, kind: input, shape index: {}]   ;;  %s131_s3 = inlined_call_operand.hbm [shape: f32[1,1], index: 3, kind: output, shape index: {}]  }
   0x1   :  { %v22_v0 = vld [vmem:[%s129_s1] sm:$0xff]  ;;  %v25_v2 = vstv %s128_s0  ;;  %s66_s20 = sadd.f32 -1.0, %s128_s0 }
   0x2   :  { %v23_v1 = vld [vmem:[%s130_s2] sm:$0xff] }
   0x3   :  { %9 = vsyncpa [#allocation5], 0  ;;  %v24_v3 = vsub.f32 %v23_v1, %v22_v0  ;;  %v28_v4 = vstv %s66_s20  ;;  %s92_s1 = smov [#allocation4]   ;;  %vm50_vm0 = vcmask 0  }
   0x4   :  { %s58_s2 = sshll.u32 %s92_s1, 4  ;;  %s59_s2 = int_to_ptr.vmem [resolvable:$true] %s58_s2 }
   0x5   :  { %v26_v5 = vmul.f32 %v25_v2, %v24_v3  ;;  %v29_v6 = vmul.f32 %v28_v4, %v24_v3  ;;  %s70_s0 = scalar_lea.vmem %s59_s2, 16  ;;  %s74_s22 = scalar_lea.vmem %s59_s2, 32 }
   0x6   :  { %p71_p0 = scmp.ne.s32.totalorder %s59_s2, %s70_s0  ;;  %p75_p1 = scmp.lt.s32.totalorder %s59_s2, %s59_s2 }
   0x7   :  { %v30_v7 = vmax.f32 %v26_v5, %v29_v6  ;;  %p76_p2 = scmp.lt.s32.totalorder %s74_s22, %s70_s0 }
   0x9   :  { %39 = vadd.xlane.f32.xlu0 %v30_v7  ;;  %p77_p3 = por %p76_p2, %p75_p1 }
   0xb   :  { %p78_p4 = pnand %p77_p3, %p71_p0 }
  0x92   :  { %v40_v8 = vpop.xlane.xlu0 %39 }
  0x93   :  { %v41_v9 = vrot.slane %v40_v8, 4 }
  0x95   :  { %v42_v10 = vadd.f32 %v41_v9, %v40_v8 }
  0x97   :  { %v43_v11 = vrot.slane %v42_v10, 2 }
  0x99   :  { %v44_v12 = vadd.f32 %v43_v11, %v42_v10 }
  0x9b   :  { %v45_v13 = vrot.slane %v44_v12, 1 }
  0x9d   :  { %v46_v14 = vadd.f32 %v45_v13, %v44_v12 }
  0x9f   :  { %67 = vpush %v46_v14 }
  0xd0   :  { %s68_s21 = spop %67 }
  0xd1   :  { %v48_v15 = vstv %s68_s21 }
  0xd2   :  { %v49_v16 = vmul.f32 0.5, %v48_v15 }
  0xd4   :  { %51 = vst.msk [vmem:[#allocation4] sm:$0x1] %vm50_vm0, %v49_v16 }
  0xd5   :  { %81 = shalt.err (!%p78_p4)
}
  0xd6   :  { %61 = dma.vmem_to_hbm [thread:$0]  %s59_s2, 16, %s131_s3, [#allocation5]  }
  0xd7   :  { %90 = dma.done.wait [#allocation5], 16  }
  0xd8   :  { %91 = vsyncadd [#allocation5], 4294967280 }
  0xd9   :  { %65 = vsyncpa [#allocation5], 1 }

</bundles_post_ra>
